<compile_context>
chip_gen: v7x
topology: tpu7x:2x2x1
jax: 0.10.0
libtpu: 0.0.40
codegen_flags: <defaults>
</compile_context>

<pallas_src>
import functools

import jax
import jax.numpy as jnp
from jax.experimental import pallas as pl
from jax.experimental.pallas import tpu as pltpu


# ----------------------------------------------------------------------------
# Fused stem kernel: conv1 (as matmul over im2col patches) + BN + ReLU + maxpool
# ----------------------------------------------------------------------------
def _stem_kernel(p_ref, w_ref, s_ref, b_ref, wsel_ref, o_ref, *, Ho, Wo, Hp, Wp):
    """One image per grid step.

    p_ref:    (1, Ho*Wo, K)   bf16  im2col patches (K = 49*Cin, order (kh, kw, cin))
    w_ref:    (K, C)          bf16  conv1 weight in matmul layout
    s_ref:    (1, C)          f32   folded BN scale  = gamma / sqrt(var + eps)
    b_ref:    (1, C)          f32   folded BN bias   = beta - mean * scale
    wsel_ref: (3, Wp, Wo)     f32   one-hot selectors for pool columns 2j-1, 2j, 2j+1
    o_ref:    (1, Hp, Wp, C)  f32   pooled output (NHWC)
    """
    # conv1 + BN + ReLU: bf16 MXU matmul, f32 accumulation, fused f32 epilogue.
    acc = jnp.dot(p_ref[0], w_ref[...], preferred_element_type=jnp.float32)  # (Ho*Wo, C)
    y = jnp.maximum(acc * s_ref[...] + b_ref[...], 0.0)

    sel0 = wsel_ref[0]
    sel1 = wsel_ref[1]
    sel2 = wsel_ref[2]

    # MaxPool2d(kernel=3, stride=2, padding=1) on the in-register activation.
    # Padding in max pooling behaves like -inf, so out-of-range taps are simply
    # clamped to an in-window index (duplicates are harmless under max).
    for i in range(Hp):
        rows = sorted({min(max(2 * i + d - 1, 0), Ho - 1) for d in range(3)})
        rmax = y[rows[0] * Wo:(rows[0] + 1) * Wo, :]                 # (Wo, C)
        for r in rows[1:]:
            rmax = jnp.maximum(rmax, y[r * Wo:(r + 1) * Wo, :])
        # Column taps + stride-2 subsample via one-hot selection matmuls.
        t0 = jnp.dot(sel0, rmax, preferred_element_type=jnp.float32)  # (Wp, C)
        t1 = jnp.dot(sel1, rmax, preferred_element_type=jnp.float32)
        t2 = jnp.dot(sel2, rmax, preferred_element_type=jnp.float32)
        o_ref[0, i, :, :] = jnp.maximum(jnp.maximum(t0, t1), t2).astype(o_ref.dtype)


# ----------------------------------------------------------------------------
# Host-side glue (im2col, layout) and the pallas_call wrapper
# ----------------------------------------------------------------------------
def _im2col_7x7_s2_p3(x_nhwc):
    """(N, H, W, Cin) -> (N, Ho*Wo, 49*Cin) patches; K ordered (kh, kw, cin)."""
    N, H, W, C = x_nhwc.shape
    Ho = (H + 2 * 3 - 7) // 2 + 1
    Wo = (W + 2 * 3 - 7) // 2 + 1
    xp = jnp.pad(x_nhwc, ((0, 0), (3, 3), (3, 3), (0, 0)))
    cols = []
    for dh in range(7):
        for dw in range(7):
            cols.append(xp[:, dh:dh + 2 * (Ho - 1) + 1:2,
                              dw:dw + 2 * (Wo - 1) + 1:2, :])
    patches = jnp.concatenate(cols, axis=-1)                # (N, Ho, Wo, 49*C)
    return patches.reshape(N, Ho * Wo, 49 * C), Ho, Wo


def thermal_module_forward(params, x_nchw):
    """x_nchw: (N, 3, H, W) -> (N, 64, Hp, Wp): conv1 -> bn1 -> relu -> maxpool."""
    w, scale, bias = params["conv1_w"], params["bn1_scale"], params["bn1_bias"]
    K, C = w.shape
    N, Cin, H, W = x_nchw.shape
    assert K == 49 * Cin

    x = jnp.transpose(x_nchw, (0, 2, 3, 1)).astype(jnp.float32)   # NCHW -> NHWC
    patches, Ho, Wo = _im2col_7x7_s2_p3(x)
    patches = patches.astype(jnp.bfloat16)                        # bf16 activations
    Hp = (Ho + 2 - 3) // 2 + 1
    Wp = (Wo + 2 - 3) // 2 + 1

    # One-hot column selectors for maxpool taps at columns 2j-1, 2j, 2j+1 (clamped).
    jj = jnp.arange(Wp)[:, None]
    kk = jnp.arange(Wo)[None, :]
    wsel = jnp.stack(
        [(kk == jnp.clip(2 * jj + d - 1, 0, Wo - 1)).astype(jnp.float32)
         for d in range(3)], axis=0)                              # (3, Wp, Wo)

    out_nhwc = pl.pallas_call(
        functools.partial(_stem_kernel, Ho=Ho, Wo=Wo, Hp=Hp, Wp=Wp),
        out_shape=jax.ShapeDtypeStruct((N, Hp, Wp, C), jnp.float32),
        grid=(N,),
        in_specs=[
            pl.BlockSpec((1, Ho * Wo, K), lambda n: (n, 0, 0)),
            pl.BlockSpec((K, C), lambda n: (0, 0)),
            pl.BlockSpec((1, C), lambda n: (0, 0)),
            pl.BlockSpec((1, C), lambda n: (0, 0)),
            pl.BlockSpec((3, Wp, Wo), lambda n: (0, 0, 0)),
        ],
        out_specs=pl.BlockSpec((1, Hp, Wp, C), lambda n: (n, 0, 0, 0)),
        compiler_params=pltpu.CompilerParams(
            dimension_semantics=("parallel",)),   # v7x: images shard across both TCs
    )(patches, w, scale.reshape(1, C), bias.reshape(1, C), wsel)

    return jnp.transpose(out_nhwc, (0, 3, 1, 2))                  # NHWC -> NCHW


# ----------------------------------------------------------------------------
# Deterministic synthetic parameters (ResNet-50 conv1/bn1 shapes, eval-mode BN fold)
# ----------------------------------------------------------------------------
def init_thermal_module_params(key, cin=3, cout=64):
    # TODO(synk): pretrained ImageNet conv1/bn1 weights are not loaded (no file or
    # network access); deterministic synthetic init with identical shapes/semantics.
    kw, kb = jax.random.split(key)
    fan_in = 7 * 7 * cin
    w = jax.random.normal(kw, (7, 7, cin, cout), jnp.float32) / jnp.sqrt(float(fan_in))
    w_mat = w.reshape(7 * 7 * cin, cout).astype(jnp.bfloat16)  # (kh, kw, cin) x cout
    gamma = jnp.ones((cout,), jnp.float32)
    beta = jax.random.normal(kb, (cout,), jnp.float32) * 0.01
    running_mean = jnp.zeros((cout,), jnp.float32)
    running_var = jnp.ones((cout,), jnp.float32)
    eps = 1e-5
    scale = gamma / jnp.sqrt(running_var + eps)     # folded eval-mode BN
    bias = beta - running_mean * scale
    return {"conv1_w": w_mat, "bn1_scale": scale, "bn1_bias": bias}


if __name__ == "__main__":
    key = jax.random.PRNGKey(0)
    kp, kx = jax.random.split(key)
    params = init_thermal_module_params(kp)

    # Small 3-channel thermal image batch, as expected by resnet50.conv1.
    x = jax.random.normal(kx, (2, 3, 32, 32), jnp.float32)

    fwd = jax.jit(thermal_module_forward)
    out = jax.block_until_ready(fwd(params, x))

    # conv1: 32 -> 16 spatial, 64 channels; maxpool: 16 -> 8 spatial.
    assert out.shape == (2, 64, 8, 8), out.shape
    assert bool(jnp.all(jnp.isfinite(out)))
    print("KERNEL_OK")
</pallas_src>

<mosaic_0001>
module attributes {stable_mosaic.version = 11 : i64} {
  func.func @_stem_kernel(%arg0: i32, %arg1: memref<1x256x147xbf16, #tpu.memory_space<vmem>>, %arg2: memref<147x64xbf16, #tpu.memory_space<vmem>>, %arg3: memref<1x64xf32, #tpu.memory_space<vmem>>, %arg4: memref<1x64xf32, #tpu.memory_space<vmem>>, %arg5: memref<3x8x16xf32, #tpu.memory_space<vmem>>, %arg6: memref<1x8x8x64xf32, #tpu.memory_space<vmem>>) attributes {dimension_semantics = [#tpu.dimension_semantics<parallel>], iteration_bounds = array<i64: 2>, scalar_prefetch = 0 : i64, scratch_operands = 0 : i64, tpu.core_type = #tpu.core_type<tc>, window_params = [{transform_indices = @transform_0, window_bounds = array<i64: 1, 256, 147>}, {pipeline_mode = #tpu.pipeline_mode<synchronous>, transform_indices = @transform_1, window_bounds = array<i64: 147, 64>}, {pipeline_mode = #tpu.pipeline_mode<synchronous>, transform_indices = @transform_2, window_bounds = array<i64: 1, 64>}, {pipeline_mode = #tpu.pipeline_mode<synchronous>, transform_indices = @transform_3, window_bounds = array<i64: 1, 64>}, {pipeline_mode = #tpu.pipeline_mode<synchronous>, transform_indices = @transform_4, window_bounds = array<i64: 3, 8, 16>}, {transform_indices = @transform_5, window_bounds = array<i64: 1, 8, 8, 64>}]} {
    %c0 = arith.constant 0 : index
    %c0_0 = arith.constant 0 : index
    %c0_1 = arith.constant 0 : index
    %0 = vector.load %arg1[%c0, %c0_0, %c0_1] : memref<1x256x147xbf16, #tpu.memory_space<vmem>>, vector<1x256x147xbf16>
    %1 = vector.shape_cast %0 : vector<1x256x147xbf16> to vector<256x147xbf16>
    %c0_2 = arith.constant 0 : index
    %c0_3 = arith.constant 0 : index
    %2 = vector.load %arg2[%c0_2, %c0_3] : memref<147x64xbf16, #tpu.memory_space<vmem>>, vector<147x64xbf16>
    %cst = arith.constant dense<0.000000e+00> : vector<256x64xf32>
    %3 = tpu.matmul %1, %2, %cst {dimension_numbers = #tpu.dot_dimension_numbers<[1], [0], [0], [1], [0, 0, 1, 1], [], []>} : vector<256x147xbf16>, vector<147x64xbf16>, vector<256x64xf32> -> vector<256x64xf32>
    %c0_4 = arith.constant 0 : index
    %c0_5 = arith.constant 0 : index
    %4 = vector.load %arg3[%c0_4, %c0_5] : memref<1x64xf32, #tpu.memory_space<vmem>>, vector<1x64xf32>
    %5 = vector.broadcast %4 : vector<1x64xf32> to vector<256x64xf32>
    %6 = arith.mulf %3, %5 : vector<256x64xf32>
    %c0_6 = arith.constant 0 : index
    %c0_7 = arith.constant 0 : index
    %7 = vector.load %arg4[%c0_6, %c0_7] : memref<1x64xf32, #tpu.memory_space<vmem>>, vector<1x64xf32>
    %8 = vector.broadcast %7 : vector<1x64xf32> to vector<256x64xf32>
    %9 = arith.addf %6, %8 : vector<256x64xf32>
    %cst_8 = arith.constant 0.000000e+00 : f32
    %10 = vector.broadcast %cst_8 : f32 to vector<256x64xf32>
    %11 = arith.maximumf %9, %10 : vector<256x64xf32>
    %c0_9 = arith.constant 0 : index
    %c0_10 = arith.constant 0 : index
    %c0_11 = arith.constant 0 : index
    %12 = vector.load %arg5[%c0_9, %c0_10, %c0_11] : memref<3x8x16xf32, #tpu.memory_space<vmem>>, vector<1x8x16xf32>
    %13 = vector.shape_cast %12 : vector<1x8x16xf32> to vector<8x16xf32>
    %c1 = arith.constant 1 : index
    %c0_12 = arith.constant 0 : index
    %c0_13 = arith.constant 0 : index
    %14 = vector.load %arg5[%c1, %c0_12, %c0_13] : memref<3x8x16xf32, #tpu.memory_space<vmem>>, vector<1x8x16xf32>
    %15 = vector.shape_cast %14 : vector<1x8x16xf32> to vector<8x16xf32>
    %c2 = arith.constant 2 : index
    %c0_14 = arith.constant 0 : index
    %c0_15 = arith.constant 0 : index
    %16 = vector.load %arg5[%c2, %c0_14, %c0_15] : memref<3x8x16xf32, #tpu.memory_space<vmem>>, vector<1x8x16xf32>
    %17 = vector.shape_cast %16 : vector<1x8x16xf32> to vector<8x16xf32>
    %18 = vector.extract_strided_slice %11 {offsets = [0, 0], sizes = [16, 64], strides = [1, 1]} : vector<256x64xf32> to vector<16x64xf32>
    %19 = vector.extract_strided_slice %11 {offsets = [16, 0], sizes = [16, 64], strides = [1, 1]} : vector<256x64xf32> to vector<16x64xf32>
    %20 = arith.maximumf %18, %19 : vector<16x64xf32>
    %cst_16 = arith.constant dense<0.000000e+00> : vector<8x64xf32>
    %21 = tpu.matmul %13, %20, %cst_16 {dimension_numbers = #tpu.dot_dimension_numbers<[1], [0], [0], [1], [0, 0, 1, 1], [], []>} : vector<8x16xf32>, vector<16x64xf32>, vector<8x64xf32> -> vector<8x64xf32>
    %cst_17 = arith.constant dense<0.000000e+00> : vector<8x64xf32>
    %22 = tpu.matmul %15, %20, %cst_17 {dimension_numbers = #tpu.dot_dimension_numbers<[1], [0], [0], [1], [0, 0, 1, 1], [], []>} : vector<8x16xf32>, vector<16x64xf32>, vector<8x64xf32> -> vector<8x64xf32>
    %cst_18 = arith.constant dense<0.000000e+00> : vector<8x64xf32>
    %23 = tpu.matmul %17, %20, %cst_18 {dimension_numbers = #tpu.dot_dimension_numbers<[1], [0], [0], [1], [0, 0, 1, 1], [], []>} : vector<8x16xf32>, vector<16x64xf32>, vector<8x64xf32> -> vector<8x64xf32>
    %24 = arith.maximumf %21, %22 : vector<8x64xf32>
    %25 = arith.maximumf %24, %23 : vector<8x64xf32>
    %c0_19 = arith.constant 0 : index
    %c0_20 = arith.constant 0 : index
    %c0_21 = arith.constant 0 : index
    %c0_22 = arith.constant 0 : index
    %26 = vector.load %arg6[%c0_19, %c0_20, %c0_21, %c0_22] : memref<1x8x8x64xf32, #tpu.memory_space<vmem>>, vector<1x1x8x64xf32>
    %27 = vector.shape_cast %26 : vector<1x1x8x64xf32> to vector<8x64xf32>
    %28 = vector.shape_cast %25 : vector<8x64xf32> to vector<1x1x8x64xf32>
    tpu.vector_store %arg6[%c0_19, %c0_20, %c0_21, %c0_22], %28 {strides = array<i32>} : memref<1x8x8x64xf32, #tpu.memory_space<vmem>>, vector<1x1x8x64xf32>,
    %29 = vector.extract_strided_slice %11 {offsets = [16, 0], sizes = [16, 64], strides = [1, 1]} : vector<256x64xf32> to vector<16x64xf32>
    %30 = vector.extract_strided_slice %11 {offsets = [32, 0], sizes = [16, 64], strides = [1, 1]} : vector<256x64xf32> to vector<16x64xf32>
    %31 = arith.maximumf %29, %30 : vector<16x64xf32>
    %32 = vector.extract_strided_slice %11 {offsets = [48, 0], sizes = [16, 64], strides = [1, 1]} : vector<256x64xf32> to vector<16x64xf32>
    %33 = arith.maximumf %31, %32 : vector<16x64xf32>
    %cst_23 = arith.constant dense<0.000000e+00> : vector<8x64xf32>
    %34 = tpu.matmul %13, %33, %cst_23 {dimension_numbers = #tpu.dot_dimension_numbers<[1], [0], [0], [1], [0, 0, 1, 1], [], []>} : vector<8x16xf32>, vector<16x64xf32>, vector<8x64xf32> -> vector<8x64xf32>
    %cst_24 = arith.constant dense<0.000000e+00> : vector<8x64xf32>
    %35 = tpu.matmul %15, %33, %cst_24 {dimension_numbers = #tpu.dot_dimension_numbers<[1], [0], [0], [1], [0, 0, 1, 1], [], []>} : vector<8x16xf32>, vector<16x64xf32>, vector<8x64xf32> -> vector<8x64xf32>
    %cst_25 = arith.constant dense<0.000000e+00> : vector<8x64xf32>
    %36 = tpu.matmul %17, %33, %cst_25 {dimension_numbers = #tpu.dot_dimension_numbers<[1], [0], [0], [1], [0, 0, 1, 1], [], []>} : vector<8x16xf32>, vector<16x64xf32>, vector<8x64xf32> -> vector<8x64xf32>
    %37 = arith.maximumf %34, %35 : vector<8x64xf32>
    %38 = arith.maximumf %37, %36 : vector<8x64xf32>
    %c0_26 = arith.constant 0 : index
    %c1_27 = arith.constant 1 : index
    %c0_28 = arith.constant 0 : index
    %c0_29 = arith.constant 0 : index
    %39 = vector.load %arg6[%c0_26, %c1_27, %c0_28, %c0_29] : memref<1x8x8x64xf32, #tpu.memory_space<vmem>>, vector<1x1x8x64xf32>
    %40 = vector.shape_cast %39 : vector<1x1x8x64xf32> to vector<8x64xf32>
    %41 = vector.shape_cast %38 : vector<8x64xf32> to vector<1x1x8x64xf32>
    tpu.vector_store %arg6[%c0_26, %c1_27, %c0_28, %c0_29], %41 {strides = array<i32>} : memref<1x8x8x64xf32, #tpu.memory_space<vmem>>, vector<1x1x8x64xf32>,
    %42 = vector.extract_strided_slice %11 {offsets = [48, 0], sizes = [16, 64], strides = [1, 1]} : vector<256x64xf32> to vector<16x64xf32>
    %43 = vector.extract_strided_slice %11 {offsets = [64, 0], sizes = [16, 64], strides = [1, 1]} : vector<256x64xf32> to vector<16x64xf32>
    %44 = arith.maximumf %42, %43 : vector<16x64xf32>
    %45 = vector.extract_strided_slice %11 {offsets = [80, 0], sizes = [16, 64], strides = [1, 1]} : vector<256x64xf32> to vector<16x64xf32>
    %46 = arith.maximumf %44, %45 : vector<16x64xf32>
    %cst_30 = arith.constant dense<0.000000e+00> : vector<8x64xf32>
    %47 = tpu.matmul %13, %46, %cst_30 {dimension_numbers = #tpu.dot_dimension_numbers<[1], [0], [0], [1], [0, 0, 1, 1], [], []>} : vector<8x16xf32>, vector<16x64xf32>, vector<8x64xf32> -> vector<8x64xf32>
    %cst_31 = arith.constant dense<0.000000e+00> : vector<8x64xf32>
    %48 = tpu.matmul %15, %46, %cst_31 {dimension_numbers = #tpu.dot_dimension_numbers<[1], [0], [0], [1], [0, 0, 1, 1], [], []>} : vector<8x16xf32>, vector<16x64xf32>, vector<8x64xf32> -> vector<8x64xf32>
    %cst_32 = arith.constant dense<0.000000e+00> : vector<8x64xf32>
    %49 = tpu.matmul %17, %46, %cst_32 {dimension_numbers = #tpu.dot_dimension_numbers<[1], [0], [0], [1], [0, 0, 1, 1], [], []>} : vector<8x16xf32>, vector<16x64xf32>, vector<8x64xf32> -> vector<8x64xf32>
    %50 = arith.maximumf %47, %48 : vector<8x64xf32>
    %51 = arith.maximumf %50, %49 : vector<8x64xf32>
    %c0_33 = arith.constant 0 : index
    %c2_34 = arith.constant 2 : index
    %c0_35 = arith.constant 0 : index
    %c0_36 = arith.constant 0 : index
    %52 = vector.load %arg6[%c0_33, %c2_34, %c0_35, %c0_36] : memref<1x8x8x64xf32, #tpu.memory_space<vmem>>, vector<1x1x8x64xf32>
    %53 = vector.shape_cast %52 : vector<1x1x8x64xf32> to vector<8x64xf32>
    %54 = vector.shape_cast %51 : vector<8x64xf32> to vector<1x1x8x64xf32>
    tpu.vector_store %arg6[%c0_33, %c2_34, %c0_35, %c0_36], %54 {strides = array<i32>} : memref<1x8x8x64xf32, #tpu.memory_space<vmem>>, vector<1x1x8x64xf32>,
    %55 = vector.extract_strided_slice %11 {offsets = [80, 0], sizes = [16, 64], strides = [1, 1]} : vector<256x64xf32> to vector<16x64xf32>
    %56 = vector.extract_strided_slice %11 {offsets = [96, 0], sizes = [16, 64], strides = [1, 1]} : vector<256x64xf32> to vector<16x64xf32>
    %57 = arith.maximumf %55, %56 : vector<16x64xf32>
    %58 = vector.extract_strided_slice %11 {offsets = [112, 0], sizes = [16, 64], strides = [1, 1]} : vector<256x64xf32> to vector<16x64xf32>
    %59 = arith.maximumf %57, %58 : vector<16x64xf32>
    %cst_37 = arith.constant dense<0.000000e+00> : vector<8x64xf32>
    %60 = tpu.matmul %13, %59, %cst_37 {dimension_numbers = #tpu.dot_dimension_numbers<[1], [0], [0], [1], [0, 0, 1, 1], [], []>} : vector<8x16xf32>, vector<16x64xf32>, vector<8x64xf32> -> vector<8x64xf32>
    %cst_38 = arith.constant dense<0.000000e+00> : vector<8x64xf32>
    %61 = tpu.matmul %15, %59, %cst_38 {dimension_numbers = #tpu.dot_dimension_numbers<[1], [0], [0], [1], [0, 0, 1, 1], [], []>} : vector<8x16xf32>, vector<16x64xf32>, vector<8x64xf32> -> vector<8x64xf32>
    %cst_39 = arith.constant dense<0.000000e+00> : vector<8x64xf32>
    %62 = tpu.matmul %17, %59, %cst_39 {dimension_numbers = #tpu.dot_dimension_numbers<[1], [0], [0], [1], [0, 0, 1, 1], [], []>} : vector<8x16xf32>, vector<16x64xf32>, vector<8x64xf32> -> vector<8x64xf32>
    %63 = arith.maximumf %60, %61 : vector<8x64xf32>
    %64 = arith.maximumf %63, %62 : vector<8x64xf32>
    %c0_40 = arith.constant 0 : index
    %c3 = arith.constant 3 : index
    %c0_41 = arith.constant 0 : index
    %c0_42 = arith.constant 0 : index
    %65 = vector.load %arg6[%c0_40, %c3, %c0_41, %c0_42] : memref<1x8x8x64xf32, #tpu.memory_space<vmem>>, vector<1x1x8x64xf32>
    %66 = vector.shape_cast %65 : vector<1x1x8x64xf32> to vector<8x64xf32>
    %67 = vector.shape_cast %64 : vector<8x64xf32> to vector<1x1x8x64xf32>
    tpu.vector_store %arg6[%c0_40, %c3, %c0_41, %c0_42], %67 {strides = array<i32>} : memref<1x8x8x64xf32, #tpu.memory_space<vmem>>, vector<1x1x8x64xf32>,
    %68 = vector.extract_strided_slice %11 {offsets = [112, 0], sizes = [16, 64], strides = [1, 1]} : vector<256x64xf32> to vector<16x64xf32>
    %69 = vector.extract_strided_slice %11 {offsets = [128, 0], sizes = [16, 64], strides = [1, 1]} : vector<256x64xf32> to vector<16x64xf32>
    %70 = arith.maximumf %68, %69 : vector<16x64xf32>
    %71 = vector.extract_strided_slice %11 {offsets = [144, 0], sizes = [16, 64], strides = [1, 1]} : vector<256x64xf32> to vector<16x64xf32>
    %72 = arith.maximumf %70, %71 : vector<16x64xf32>
    %cst_43 = arith.constant dense<0.000000e+00> : vector<8x64xf32>
    %73 = tpu.matmul %13, %72, %cst_43 {dimension_numbers = #tpu.dot_dimension_numbers<[1], [0], [0], [1], [0, 0, 1, 1], [], []>} : vector<8x16xf32>, vector<16x64xf32>, vector<8x64xf32> -> vector<8x64xf32>
    %cst_44 = arith.constant dense<0.000000e+00> : vector<8x64xf32>
    %74 = tpu.matmul %15, %72, %cst_44 {dimension_numbers = #tpu.dot_dimension_numbers<[1], [0], [0], [1], [0, 0, 1, 1], [], []>} : vector<8x16xf32>, vector<16x64xf32>, vector<8x64xf32> -> vector<8x64xf32>
    %cst_45 = arith.constant dense<0.000000e+00> : vector<8x64xf32>
    %75 = tpu.matmul %17, %72, %cst_45 {dimension_numbers = #tpu.dot_dimension_numbers<[1], [0], [0], [1], [0, 0, 1, 1], [], []>} : vector<8x16xf32>, vector<16x64xf32>, vector<8x64xf32> -> vector<8x64xf32>
    %76 = arith.maximumf %73, %74 : vector<8x64xf32>
    %77 = arith.maximumf %76, %75 : vector<8x64xf32>
    %c0_46 = arith.constant 0 : index
    %c4 = arith.constant 4 : index
    %c0_47 = arith.constant 0 : index
    %c0_48 = arith.constant 0 : index
    %78 = vector.load %arg6[%c0_46, %c4, %c0_47, %c0_48] : memref<1x8x8x64xf32, #tpu.memory_space<vmem>>, vector<1x1x8x64xf32>
    %79 = vector.shape_cast %78 : vector<1x1x8x64xf32> to vector<8x64xf32>
    %80 = vector.shape_cast %77 : vector<8x64xf32> to vector<1x1x8x64xf32>
    tpu.vector_store %arg6[%c0_46, %c4, %c0_47, %c0_48], %80 {strides = array<i32>} : memref<1x8x8x64xf32, #tpu.memory_space<vmem>>, vector<1x1x8x64xf32>,
    %81 = vector.extract_strided_slice %11 {offsets = [144, 0], sizes = [16, 64], strides = [1, 1]} : vector<256x64xf32> to vector<16x64xf32>
    %82 = vector.extract_strided_slice %11 {offsets = [160, 0], sizes = [16, 64], strides = [1, 1]} : vector<256x64xf32> to vector<16x64xf32>
    %83 = arith.maximumf %81, %82 : vector<16x64xf32>
    %84 = vector.extract_strided_slice %11 {offsets = [176, 0], sizes = [16, 64], strides = [1, 1]} : vector<256x64xf32> to vector<16x64xf32>
    %85 = arith.maximumf %83, %84 : vector<16x64xf32>
    %cst_49 = arith.constant dense<0.000000e+00> : vector<8x64xf32>
    %86 = tpu.matmul %13, %85, %cst_49 {dimension_numbers = #tpu.dot_dimension_numbers<[1], [0], [0], [1], [0, 0, 1, 1], [], []>} : vector<8x16xf32>, vector<16x64xf32>, vector<8x64xf32> -> vector<8x64xf32>
    %cst_50 = arith.constant dense<0.000000e+00> : vector<8x64xf32>
    %87 = tpu.matmul %15, %85, %cst_50 {dimension_numbers = #tpu.dot_dimension_numbers<[1], [0], [0], [1], [0, 0, 1, 1], [], []>} : vector<8x16xf32>, vector<16x64xf32>, vector<8x64xf32> -> vector<8x64xf32>
    %cst_51 = arith.constant dense<0.000000e+00> : vector<8x64xf32>
    %88 = tpu.matmul %17, %85, %cst_51 {dimension_numbers = #tpu.dot_dimension_numbers<[1], [0], [0], [1], [0, 0, 1, 1], [], []>} : vector<8x16xf32>, vector<16x64xf32>, vector<8x64xf32> -> vector<8x64xf32>
    %89 = arith.maximumf %86, %87 : vector<8x64xf32>
    %90 = arith.maximumf %89, %88 : vector<8x64xf32>
    %c0_52 = arith.constant 0 : index
    %c5 = arith.constant 5 : index
    %c0_53 = arith.constant 0 : index
    %c0_54 = arith.constant 0 : index
    %91 = vector.load %arg6[%c0_52, %c5, %c0_53, %c0_54] : memref<1x8x8x64xf32, #tpu.memory_space<vmem>>, vector<1x1x8x64xf32>
    %92 = vector.shape_cast %91 : vector<1x1x8x64xf32> to vector<8x64xf32>
    %93 = vector.shape_cast %90 : vector<8x64xf32> to vector<1x1x8x64xf32>
    tpu.vector_store %arg6[%c0_52, %c5, %c0_53, %c0_54], %93 {strides = array<i32>} : memref<1x8x8x64xf32, #tpu.memory_space<vmem>>, vector<1x1x8x64xf32>,
    %94 = vector.extract_strided_slice %11 {offsets = [176, 0], sizes = [16, 64], strides = [1, 1]} : vector<256x64xf32> to vector<16x64xf32>
    %95 = vector.extract_strided_slice %11 {offsets = [192, 0], sizes = [16, 64], strides = [1, 1]} : vector<256x64xf32> to vector<16x64xf32>
    %96 = arith.maximumf %94, %95 : vector<16x64xf32>
    %97 = vector.extract_strided_slice %11 {offsets = [208, 0], sizes = [16, 64], strides = [1, 1]} : vector<256x64xf32> to vector<16x64xf32>
    %98 = arith.maximumf %96, %97 : vector<16x64xf32>
    %cst_55 = arith.constant dense<0.000000e+00> : vector<8x64xf32>
    %99 = tpu.matmul %13, %98, %cst_55 {dimension_numbers = #tpu.dot_dimension_numbers<[1], [0], [0], [1], [0, 0, 1, 1], [], []>} : vector<8x16xf32>, vector<16x64xf32>, vector<8x64xf32> -> vector<8x64xf32>
    %cst_56 = arith.constant dense<0.000000e+00> : vector<8x64xf32>
    %100 = tpu.matmul %15, %98, %cst_56 {dimension_numbers = #tpu.dot_dimension_numbers<[1], [0], [0], [1], [0, 0, 1, 1], [], []>} : vector<8x16xf32>, vector<16x64xf32>, vector<8x64xf32> -> vector<8x64xf32>
    %cst_57 = arith.constant dense<0.000000e+00> : vector<8x64xf32>
    %101 = tpu.matmul %17, %98, %cst_57 {dimension_numbers = #tpu.dot_dimension_numbers<[1], [0], [0], [1], [0, 0, 1, 1], [], []>} : vector<8x16xf32>, vector<16x64xf32>, vector<8x64xf32> -> vector<8x64xf32>
    %102 = arith.maximumf %99, %100 : vector<8x64xf32>
    %103 = arith.maximumf %102, %101 : vector<8x64xf32>
    %c0_58 = arith.constant 0 : index
    %c6 = arith.constant 6 : index
    %c0_59 = arith.constant 0 : index
    %c0_60 = arith.constant 0 : index
    %104 = vector.load %arg6[%c0_58, %c6, %c0_59, %c0_60] : memref<1x8x8x64xf32, #tpu.memory_space<vmem>>, vector<1x1x8x64xf32>
    %105 = vector.shape_cast %104 : vector<1x1x8x64xf32> to vector<8x64xf32>
    %106 = vector.shape_cast %103 : vector<8x64xf32> to vector<1x1x8x64xf32>
    tpu.vector_store %arg6[%c0_58, %c6, %c0_59, %c0_60], %106 {strides = array<i32>} : memref<1x8x8x64xf32, #tpu.memory_space<vmem>>, vector<1x1x8x64xf32>,
    %107 = vector.extract_strided_slice %11 {offsets = [208, 0], sizes = [16, 64], strides = [1, 1]} : vector<256x64xf32> to vector<16x64xf32>
    %108 = vector.extract_strided_slice %11 {offsets = [224, 0], sizes = [16, 64], strides = [1, 1]} : vector<256x64xf32> to vector<16x64xf32>
    %109 = arith.maximumf %107, %108 : vector<16x64xf32>
    %110 = vector.extract_strided_slice %11 {offsets = [240, 0], sizes = [16, 64], strides = [1, 1]} : vector<256x64xf32> to vector<16x64xf32>
    %111 = arith.maximumf %109, %110 : vector<16x64xf32>
    %cst_61 = arith.constant dense<0.000000e+00> : vector<8x64xf32>
    %112 = tpu.matmul %13, %111, %cst_61 {dimension_numbers = #tpu.dot_dimension_numbers<[1], [0], [0], [1], [0, 0, 1, 1], [], []>} : vector<8x16xf32>, vector<16x64xf32>, vector<8x64xf32> -> vector<8x64xf32>
    %cst_62 = arith.constant dense<0.000000e+00> : vector<8x64xf32>
    %113 = tpu.matmul %15, %111, %cst_62 {dimension_numbers = #tpu.dot_dimension_numbers<[1], [0], [0], [1], [0, 0, 1, 1], [], []>} : vector<8x16xf32>, vector<16x64xf32>, vector<8x64xf32> -> vector<8x64xf32>
    %cst_63 = arith.constant dense<0.000000e+00> : vector<8x64xf32>
    %114 = tpu.matmul %17, %111, %cst_63 {dimension_numbers = #tpu.dot_dimension_numbers<[1], [0], [0], [1], [0, 0, 1, 1], [], []>} : vector<8x16xf32>, vector<16x64xf32>, vector<8x64xf32> -> vector<8x64xf32>
    %115 = arith.maximumf %112, %113 : vector<8x64xf32>
    %116 = arith.maximumf %115, %114 : vector<8x64xf32>
    %c0_64 = arith.constant 0 : index
    %c7 = arith.constant 7 : index
    %c0_65 = arith.constant 0 : index
    %c0_66 = arith.constant 0 : index
    %117 = vector.load %arg6[%c0_64, %c7, %c0_65, %c0_66] : memref<1x8x8x64xf32, #tpu.memory_space<vmem>>, vector<1x1x8x64xf32>
    %118 = vector.shape_cast %117 : vector<1x1x8x64xf32> to vector<8x64xf32>
    %119 = vector.shape_cast %116 : vector<8x64xf32> to vector<1x1x8x64xf32>
    tpu.vector_store %arg6[%c0_64, %c7, %c0_65, %c0_66], %119 {strides = array<i32>} : memref<1x8x8x64xf32, #tpu.memory_space<vmem>>, vector<1x1x8x64xf32>,
    return
  }
  func.func @transform_0(%arg0: i32) -> (i32, i32, i32) {
    %c0_i32 = arith.constant 0 : i32
    %c0_i32_0 = arith.constant 0 : i32
    %c0_i32_1 = arith.constant 0 : i32
    return %arg0, %c0_i32, %c0_i32_0 : i32, i32, i32
  }
  func.func @transform_1(%arg0: i32) -> (i32, i32) {
    %c0_i32 = arith.constant 0 : i32
    %c0_i32_0 = arith.constant 0 : i32
    %c0_i32_1 = arith.constant 0 : i32
    return %c0_i32, %c0_i32_0 : i32, i32
  }
  func.func @transform_2(%arg0: i32) -> (i32, i32) {
    %c0_i32 = arith.constant 0 : i32
    %c0_i32_0 = arith.constant 0 : i32
    %c0_i32_1 = arith.constant 0 : i32
    return %c0_i32, %c0_i32_0 : i32, i32
  }
  func.func @transform_3(%arg0: i32) -> (i32, i32) {
    %c0_i32 = arith.constant 0 : i32
    %c0_i32_0 = arith.constant 0 : i32
    %c0_i32_1 = arith.constant 0 : i32
    return %c0_i32, %c0_i32_0 : i32, i32
  }
  func.func @transform_4(%arg0: i32) -> (i32, i32, i32) {
    %c0_i32 = arith.constant 0 : i32
    %c0_i32_0 = arith.constant 0 : i32
    %c0_i32_1 = arith.constant 0 : i32
    %c0_i32_2 = arith.constant 0 : i32
    return %c0_i32, %c0_i32_0, %c0_i32_1 : i32, i32, i32
  }
  func.func @transform_5(%arg0: i32) -> (i32, i32, i32, i32) {
    %c0_i32 = arith.constant 0 : i32
    %c0_i32_0 = arith.constant 0 : i32
    %c0_i32_1 = arith.constant 0 : i32
    %c0_i32_2 = arith.constant 0 : i32
    return %arg0, %c0_i32, %c0_i32_0, %c0_i32_1 : i32, i32, i32, i32
  }
}

</mosaic_0001>

<bundles_post_ra>
// kernel: thermal_module_forward.1
= control target key start
LH: loop header
LB: loop body
LE: loop exit
PB: predicated region body
PF: predicated region fallthrough
CT: control target
= control target key end

     0   :  { %10 = vsyncpa [#allocation3], 0  ;;  %s3708_s0 = inlined_call_operand.vmem [shape: bf16[2,256,147], index: 0, kind: input, shape index: {}]   ;;  %s3709_s1 = inlined_call_operand.vmem [shape: bf16[147,64], index: 1, kind: input, shape index: {}]   ;;  %s3710_s2 = inlined_call_operand.vmem [shape: f32[1,64], index: 2, kind: input, shape index: {}]   ;;  %s3711_s3 = inlined_call_operand.vmem [shape: f32[1,64], index: 3, kind: input, shape index: {}]   ;;  %s3712_s4 = inlined_call_operand.vmem [shape: f32[3,8,16], index: 4, kind: input, shape index: {}]   ;;  %s3713_s5 = inlined_call_operand.hbm [shape: f32[2,8,8,64], index: 5, kind: output, shape index: {}]  }
   0x1   :  { %12 = vsyncpa [#allocation3 + $0x1], 0  ;;  %s3281_s18 = smov 0   ;;  %s3283_s19 = smov 0  }
   0x2   :  { %s3285_s20 = smov 0   ;;  %s3287_s21 = smov 0  }
   0x3 LB: > { %s3302_s22 = sadd.s32 4294967295, %s3241_s21   ;;  %s2636_s23 = sadd.s32 4294967294, %s3241_s21   ;;  %s3241_s21 = sphi %s3287_s21, %s3719_s21   ;;  %s3237_s20 = sphi %s3285_s20, %s3718_s20   ;;  %s3233_s19 = sphi %s3283_s19, %s3717_s19   ;;  %s3229_s18 = sphi %s3281_s18, %s3716_s18  }
   0x4   : > { %s3306_s24 = sadd.s32 1, %s3241_s21   ;;  %s135_s25 = sadd.s32 1, %s3237_s20 }
   0x5   : > { %s132_s26 = ssub.s32 %s3241_s21, %s3306_s24  ;;  %p145_p0 = scmp.ne.s32.totalorder %s3237_s20, %s3233_s19 }
   0x6   : > { %p133_p1 = scmp.eq.s32.totalorder %s132_s26, 0  ;;  %p146_p2 = scmp.eq.s32.totalorder %s3302_s22, 1 }
   0x7   : > { %p151_p3 = scmp.ne.s32.totalorder %s3233_s19, %s3229_s18  ;;  %p152_p4 = scmp.eq.s32.totalorder %s2636_s23, 1 }
   0x8   : > { %s3317_s27 = scalar_select %p133_p1, %s3237_s20, %s135_s25  }
   0x9   : > { %p3319_p5 = por %p146_p2, %p145_p0  ;;  %p3323_p6 = por %p152_p4, %p151_p3 }
   0xa   : > { %p2639_p7 = scmp.ge.s32.totalorder %s3241_s21, 1  ;;  %p190_p8 = scmp.lt.s32.totalorder %s3241_s21, 3 }
   0xc   : > { %p191_p9 = pnand %p2639_p7, %p190_p8 }
   0xd   : > { %v3121_v0 = vld [vmem:[%s3709_s1] sm:$0xff] (!%p191_p9)   ;;  %v3243_v1 = vmov (!%p191_p9), 0   ;;  %v3122_v2 = vld [vmem:[%s3709_s1 + $0x8] sm:$0xff] (!%p191_p9)   ;;  %v3123_v3 = vld [vmem:[%s3709_s1 + $0x10] sm:$0xff] (!%p191_p9)   ;;  %p218_p10 = scmp.lt.s32.totalorder (!%p191_p9), %s3302_s22, 1  ;;  %vm476_vm0 = vcmask (!%p191_p9), 154624  }
   0xe   : > { %194 = sbr.rel (%p191_p9) target bundleno = 634 (0x27a), region = 40  ;;  %532 = vmatprep.subr.bf16.mxu0 (!%p191_p9), %v3243_v1  ;;  %3055 = vmatprep.subr.bf16.mxu1 (!%p191_p9), %v3243_v1  ;;  %v3124_v4 = vld [vmem:[%s3709_s1 + $0x18] sm:$0xff] (!%p191_p9)   ;;  %v3125_v6 = vld [vmem:[%s3709_s1 + $0x20] sm:$0xff] (!%p191_p9)   ;;  %v3126_v7 = vld [vmem:[%s3709_s1 + $0x28] sm:$0xff] (!%p191_p9)   ;;  %vm525_vm1 = vcmask (!%p191_p9), 1040384   ;;  %vm526_vm2 = vcmask (!%p191_p9), 1041408  }
   0xf   : > { %533 = vmatpush1.bf16.msra.mxu0 (!%p191_p9), %v3121_v0  ;;  %3065 = vmatpush1.bf16.msra.mxu1 (!%p191_p9), %v3121_v0  ;;  %v3127_v8 = vld [vmem:[%s3709_s1 + $0x30] sm:$0xff] (!%p191_p9)   ;;  %v3128_v9 = vld [vmem:[%s3709_s1 + $0x38] sm:$0xff] (!%p191_p9)   ;;  %v3244_v10 = vmov (!%p191_p9), 65535   ;;  %v3129_v12 = vld [vmem:[%s3709_s1 + $0x40] sm:$0xff] (!%p191_p9)   ;;  %v3245_v47 = vmov (!%p191_p9), 0.0|0.0   ;;  %vm3246_vm3 = vmmov (!%p191_p9), 0  }
  0x10   : > { %534 = vmatprep.subr.bf16.mxu0 (!%p191_p9), %v3243_v1  ;;  %3056 = vmatprep.subr.bf16.mxu1 (!%p191_p9), %v3243_v1  ;;  %v527_v11 = vsel (!%p191_p9), %vm525_vm1, 4294967295, %v3244_v10  ;;  %v3130_v13 = vld [vmem:[%s3709_s1 + $0x48] ss:$0 sps:$4 sm:$0x33] (!%p191_p9)   ;;  %v3247_v48 = vmov (!%p191_p9), 0.0   ;;  %vm810_vm4 = vcmask (!%p191_p9), 130048  }
  0x11   : > { %v528_v15 = vsel (!%p191_p9), %vm526_vm2, %v527_v11, 0  ;;  %v3422_v53 = vld [vmem:[%s3710_s2] ss:$0 sm:$0xff] (!%p191_p9)  ;;  %s215_s8 = sand.u32 (!%p191_p9), 1, %s3233_s19   ;;  %vm1032_vm5 = vcmask (!%p191_p9), 523264  }
  0x12   : > { %v530_v16 = vand.u32 (!%p191_p9), %v3130_v13, %v528_v15  ;;  %v3430_v59 = vld [vmem:[%s3711_s3] ss:$0 sm:$0xff] (!%p191_p9)  ;;  %s2640_s9 = sshll.u32 (!%p191_p9), %s215_s8, 6  ;;  %s3667_s16 = scalar_lea.sflag (!%p191_p9), [#allocation3], %s215_s8 }
  0x13   : > { %535 = vmatpush1.bf16.msra.mxu0 (!%p191_p9), %v3122_v2  ;;  %3066 = vmatpush1.bf16.msra.mxu1 (!%p191_p9), %v3122_v2  ;;  %s3638_s10 = scalar_lea.vmem (!%p191_p9), [#allocation2], %s2640_s9 }
  0x14   : > { %536 = vmatprep.subr.bf16.mxu0 (!%p191_p9), %v3243_v1  ;;  %3057 = vmatprep.subr.bf16.mxu1 (!%p191_p9), %v3243_v1  ;;  %s2574_s12 = sshll.u32 (!%p191_p9), %s3638_s10, 4  ;;  %s3661_s12 = int_to_ptr.vmem [resolvable:$true] %s2574_s12 }
  0x15   : > { %s219_s11 = scalar_select %p218_p10, %s3302_s22, 1 }
  0x17   : > { %537 = vmatpush1.bf16.msra.mxu0 %v3123_v3  ;;  %s2741_s14 = sshll.u32 %s219_s11, 8  ;;  %3067 = vmatpush1.bf16.msra.mxu1 %v3123_v3  ;;  %s2742_s11 = sshll.u32 %s3302_s22, 10 }
  0x18   : > { %538 = vmatprep.subr.bf16.mxu0 %v3243_v1  ;;  %s3346_s17 = scalar_lea.vmem %s3708_s0, %s2741_s14  ;;  %3058 = vmatprep.subr.bf16.mxu1 %v3243_v1  ;;  %s3659_s15 = scalar_lea.hbm %s3713_s5, %s2742_s11 }
  0x19   : > { %v3133_v5 = vld [vmem:[%s3346_s17 + $0x4] ss:$8 sps:$4 sm:$0xff]   ;;  %v3131_v17 = vld [vmem:[%s3346_s17] ss:$8 sps:$4 sm:$0xff]   ;;  %v3134_v19 = vld [vmem:[%s3346_s17 + $0x14] ss:$8 sps:$4 sm:$0xff]  }
  0x1a   : > { %2685 = vmatprep.mubr.msk.bf16.mxu0 %vm476_vm0, %v3133_v5  ;;  %v3172_v14 = vld [vmem:[%s3346_s17 + $0xe4] ss:$8 sps:$4 sm:$0xff]   ;;  %v3170_v18 = vld [vmem:[%s3346_s17 + $0xe0] ss:$8 sps:$4 sm:$0xff]   ;;  %v3176_v20 = vld [vmem:[%s3346_s17 + $0xf4] ss:$8 sps:$4 sm:$0xff]  }
  0x1b   : > { %539 = vmatpush1.bf16.msra.mxu0 %v3124_v4  ;;  %3068 = vmatpush1.bf16.msra.mxu1 %v3124_v4  ;;  %v3136_v21 = vld [vmem:[%s3346_s17 + $0x10] ss:$8 sps:$4 sm:$0xff]   ;;  %v3137_v23 = vld [vmem:[%s3346_s17 + $0x24] ss:$8 sps:$4 sm:$0xff]   ;;  %v3139_v24 = vld [vmem:[%s3346_s17 + $0x20] ss:$8 sps:$4 sm:$0xff]  }
  0x1c   : > { %540 = vmatprep.subr.bf16.mxu0 %v3243_v1  ;;  %3059 = vmatprep.subr.bf16.mxu1 %v3243_v1  ;;  %v3178_v22 = vld [vmem:[%s3346_s17 + $0xf0] ss:$8 sps:$4 sm:$0xff]   ;;  %v3140_v25 = vld [vmem:[%s3346_s17 + $0x34] ss:$8 sps:$4 sm:$0xff]   ;;  %v3143_v27 = vld [vmem:[%s3346_s17 + $0x44] ss:$8 sps:$4 sm:$0xff]  }
  0x1d   : > { %2699 = vmatprep.mubr.msk.bf16.mxu1 %vm476_vm0, %v3172_v14  ;;  %v3142_v26 = vld [vmem:[%s3346_s17 + $0x30] ss:$8 sps:$4 sm:$0xff]   ;;  %v3145_v28 = vld [vmem:[%s3346_s17 + $0x40] ss:$8 sps:$4 sm:$0xff]   ;;  %v3146_v29 = vld [vmem:[%s3346_s17 + $0x54] ss:$8 sps:$4 sm:$0xff]  }
  0x1e   : > { %v3148_v30 = vld [vmem:[%s3346_s17 + $0x50] ss:$8 sps:$4 sm:$0xff]   ;;  %v3149_v31 = vld [vmem:[%s3346_s17 + $0x64] ss:$8 sps:$4 sm:$0xff]   ;;  %v3151_v32 = vld [vmem:[%s3346_s17 + $0x60] ss:$8 sps:$4 sm:$0xff]  }
  0x1f   : > { %541 = vmatpush1.bf16.msra.mxu0 %v3125_v6  ;;  %3069 = vmatpush1.bf16.msra.mxu1 %v3125_v6  ;;  %v3152_v33 = vld [vmem:[%s3346_s17 + $0x74] ss:$8 sps:$4 sm:$0xff]   ;;  %v3154_v34 = vld [vmem:[%s3346_s17 + $0x70] ss:$8 sps:$4 sm:$0xff]   ;;  %v3155_v35 = vld [vmem:[%s3346_s17 + $0x84] ss:$8 sps:$4 sm:$0xff]  }
  0x20   : > { %542 = vmatprep.subr.bf16.mxu0 %v3243_v1  ;;  %3060 = vmatprep.subr.bf16.mxu1 %v3243_v1  ;;  %v3157_v36 = vld [vmem:[%s3346_s17 + $0x80] ss:$8 sps:$4 sm:$0xff]   ;;  %v3158_v37 = vld [vmem:[%s3346_s17 + $0x94] ss:$8 sps:$4 sm:$0xff]   ;;  %v3160_v38 = vld [vmem:[%s3346_s17 + $0x90] ss:$8 sps:$4 sm:$0xff]  }
  0x21   : > { %v3161_v39 = vld [vmem:[%s3346_s17 + $0xa4] ss:$8 sps:$4 sm:$0xff]   ;;  %v3163_v40 = vld [vmem:[%s3346_s17 + $0xa0] ss:$8 sps:$4 sm:$0xff]   ;;  %v3164_v41 = vld [vmem:[%s3346_s17 + $0xb4] ss:$8 sps:$4 sm:$0xff]  }
  0x22   : > { %v3166_v42 = vld [vmem:[%s3346_s17 + $0xb0] ss:$8 sps:$4 sm:$0xff]   ;;  %v3167_v43 = vld [vmem:[%s3346_s17 + $0xc4] ss:$8 sps:$4 sm:$0xff]   ;;  %v3169_v44 = vld [vmem:[%s3346_s17 + $0xc0] ss:$8 sps:$4 sm:$0xff]  }
  0x23   : > { %543 = vmatpush1.bf16.msra.mxu0 %v3126_v7  ;;  %3070 = vmatpush1.bf16.msra.mxu1 %v3126_v7  ;;  %v3173_v45 = vld [vmem:[%s3346_s17 + $0xd4] ss:$8 sps:$4 sm:$0xff]   ;;  %v3175_v46 = vld [vmem:[%s3346_s17 + $0xd0] ss:$8 sps:$4 sm:$0xff]   ;;  %s3179_s22 = scalar_lea.vmem %s3661_s12, 1024  ;;  %s3248_s17 = smov [#allocation2]  }
  0x24   : > { %544 = vmatprep.subr.bf16.mxu0 %v3243_v1  ;;  %3061 = vmatprep.subr.bf16.mxu1 %v3243_v1  ;;  %p3180_p11 = scmp.ne.s32.totalorder %s3661_s12, %s3179_s22  ;;  %s3183_s23 = sshll.u32 %s3248_s17, 4  ;;  %s3184_s23 = int_to_ptr.vmem [resolvable:$false] %s3183_s23 }
  0x25   : > { %s3185_s25 = scalar_lea.vmem %s3184_s23, 2048  ;;  %p3186_p0 = scmp.lt.s32.totalorder %s3661_s12, %s3184_s23 }
  0x26   : > { %p3181_p12 = pnand %p3180_p11, %p3319_p5  ;;  %p3187_p1 = scmp.lt.s32.totalorder %s3185_s25, %s3179_s22 }
  0x27   : > { %545 = vmatpush1.bf16.msra.mxu0 %v3127_v8  ;;  %3071 = vmatpush1.bf16.msra.mxu1 %v3127_v8 }
  0x28   : > { %546 = vmatprep.subr.bf16.mxu0 %v3243_v1  ;;  %3062 = vmatprep.subr.bf16.mxu1 %v3243_v1  ;;  %p3182_p13 = pneg %p3181_p12  ;;  %p3188_p2 = por %p3187_p1, %p3186_p0 }
  0x2a   : > { %p3189_p3 = pnand %p3188_p2, %p3182_p13 }
  0x2b   : > { %547 = vmatpush1.bf16.msra.mxu0 %v3128_v9  ;;  %3072 = vmatpush1.bf16.msra.mxu1 %v3128_v9 }
  0x2c   : > { %548 = vmatprep.subr.bf16.mxu0 %v3243_v1  ;;  %3063 = vmatprep.subr.bf16.mxu1 %v3243_v1 }
  0x2f   : > { %549 = vmatpush1.bf16.msra.mxu0 %v3129_v12  ;;  %3073 = vmatpush1.bf16.msra.mxu1 %v3129_v12 }
  0x30   : > { %550 = vmatprep.subr.bf16.mxu0 %v3243_v1  ;;  %3064 = vmatprep.subr.bf16.mxu1 %v3243_v1 }
  0x33   : > { %551 = vmatpush1.bf16.msra.mxu0 %v530_v16  ;;  %3074 = vmatpush1.bf16.msra.mxu1 %v530_v16 }
  0x34   : > { %2983 = vmatprep.subr.bf16.mxu1 %v3245_v47 }
  0x36   : > { %565 = vmatmul.mubr.bf16.vlgmr.msra.gmra.mrb[0].mxu0 %v3131_v17  ;;  %677 = vmatmul.mubr.bf16.vlgmr.msra.gmra.mrb[0].mxu1 %v3170_v18 }
  0x37   : > { %2686 = vmatprep.mubr.msk.bf16.mxu0 %vm476_vm0, %v3134_v19  ;;  %2700 = vmatprep.mubr.msk.bf16.mxu1 %vm476_vm0, %v3176_v20 }
  0x3e   : > { %573 = vmatmul.mubr.bf16.gmra.mrb[4].mxu0 %v3136_v21  ;;  %685 = vmatmul.mubr.bf16.gmra.mrb[4].mxu1 %v3178_v22 }
  0x3f   : > { %2687 = vmatprep.mubr.msk.bf16.mxu0 %vm476_vm0, %v3137_v23  ;;  %2819 = vmatprep.mubr.msk.f32.mxu1 %vm3246_vm3, %v3247_v48 }
  0x46   : > { %581 = vmatmul.mubr.bf16.gmra.mrb[8].mxu0 %v3139_v24 }
  0x47   : > { %2688 = vmatprep.mubr.msk.bf16.mxu0 %vm476_vm0, %v3140_v25 }
  0x4e   : > { %589 = vmatmul.mubr.bf16.gmra.mrb[12].mxu0 %v3142_v26 }
  0x4f   : > { %2689 = vmatprep.mubr.msk.bf16.mxu0 %vm476_vm0, %v3143_v27  ;;  %v3450_v27 = vld [vmem:[%s3712_s4] sm:$0xff] }
  0x56   : > { %597 = vmatmul.mubr.bf16.gmra.mrb[16].mxu0 %v3145_v28 }
  0x57   : > { %2690 = vmatprep.mubr.msk.bf16.mxu0 %vm476_vm0, %v3146_v29 }
  0x5e   : > { %605 = vmatmul.mubr.bf16.gmra.mrb[20].mxu0 %v3148_v30 }
  0x5f   : > { %2691 = vmatprep.mubr.msk.bf16.mxu0 %vm476_vm0, %v3149_v31 }
  0x66   : > { %613 = vmatmul.mubr.bf16.gmra.mrb[24].mxu0 %v3151_v32 }
  0x67   : > { %2692 = vmatprep.mubr.msk.bf16.mxu0 %vm476_vm0, %v3152_v33 }
  0x6e   : > { %621 = vmatmul.mubr.bf16.gmra.mrb[28].mxu0 %v3154_v34  ;;  %v3461_v34 = vld [vmem:[%s3712_s4 + $0x8] sm:$0xff] }
  0x6f   : > { %2693 = vmatprep.mubr.msk.bf16.mxu0 %vm476_vm0, %v3155_v35 }
  0x76   : > { %629 = vmatmul.mubr.bf16.gmra.mrb[32].mxu0 %v3157_v36 }
  0x77   : > { %2694 = vmatprep.mubr.msk.bf16.mxu0 %vm476_vm0, %v3158_v37 }
  0x7e   : > { %637 = vmatmul.mubr.bf16.gmra.mrb[36].mxu0 %v3160_v38 }
  0x7f   : > { %2695 = vmatprep.mubr.msk.bf16.mxu0 %vm476_vm0, %v3161_v39 }
  0x86   : > { %645 = vmatmul.mubr.bf16.gmra.mrb[40].mxu0 %v3163_v40 }
  0x87   : > { %2696 = vmatprep.mubr.msk.bf16.mxu0 %vm476_vm0, %v3164_v41  ;;  %v3474_v41 = vld [vmem:[%s3712_s4 + $0x10] sm:$0xff] }
  0x8e   : > { %653 = vmatmul.mubr.bf16.gmra.mrb[44].mxu0 %v3166_v42 }
  0x8f   : > { %2697 = vmatprep.mubr.msk.bf16.mxu0 %vm476_vm0, %v3167_v43 }
  0x96   : > { %661 = vmatmul.mubr.bf16.gmra.mrb[48].mxu0 %v3169_v44 }
  0x97   : > { %2698 = vmatprep.mubr.msk.bf16.mxu0 %vm476_vm0, %v3173_v45 }
  0x9e   : > { %669 = vmatmul.mubr.bf16.gmra.mrb[52].mxu0 %v3175_v46 }
 0x109   : > { %v566_v49 = vpop.f32.mrb[0].mxu0  ;;  %v3417_v50 = vpop.f32.mrb[0].mxu1 }
 0x10a   : > { %v568_v51 = vpop.f32.mrb[1].mxu0  ;;  %v680_v52 = vpop.f32.mrb[1].mxu1  ;;  %v700_v58 = vmul.f32 %v3422_v53, %v566_v49 }
 0x10b   : > { %v569_v54 = vpop.f32.mrb[2].mxu0  ;;  %v3424_v55 = vpop.f32.mrb[2].mxu1 }
 0x10c   : > { %v571_v56 = vpop.f32.mrb[3].mxu0  ;;  %v683_v57 = vpop.f32.mrb[3].mxu1  ;;  %v701_v60 = vmul.f32 %v3422_v53, %v569_v54  ;;  %v739_v63 = vadd.f32 %v3430_v59, %v700_v58 }
 0x10e   : > { %v740_v5 = vadd.f32 %v3430_v59, %v701_v60  ;;  %v771_v10 = vmax.f32 %v739_v63, 0.0 }
 0x110   : > { %v772_v13 = vmax.f32 %v740_v5, 0.0 }
 0x111   : > { %v574_v61 = vpop.f32.mrb[4].mxu0  ;;  %v3433_v62 = vpop.f32.mrb[4].mxu1 }
 0x112   : > { %v702_v0 = vmul.f32 %v3422_v53, %v574_v61  ;;  %v576_v1 = vpop.f32.mrb[5].mxu0  ;;  %v688_v2 = vpop.f32.mrb[5].mxu1 }
 0x113   : > { %v577_v3 = vpop.f32.mrb[6].mxu0  ;;  %v3437_v4 = vpop.f32.mrb[6].mxu1 }
 0x114   : > { %v741_v6 = vadd.f32 %v3430_v59, %v702_v0  ;;  %v703_v7 = vmul.f32 %v3422_v53, %v577_v3  ;;  %v579_v8 = vpop.f32.mrb[7].mxu0  ;;  %v691_v9 = vpop.f32.mrb[7].mxu1 }
 0x116   : > { %v773_v11 = vmax.f32 %v741_v6, 0.0  ;;  %v742_v12 = vadd.f32 %v3430_v59, %v703_v7 }
 0x118   : > { %v808_v14 = vmax.f32 %v771_v10, %v773_v11  ;;  %v774_v15 = vmax.f32 %v742_v12, 0.0 }
 0x119   : > { %v582_v16 = vpop.f32.mrb[8].mxu0 }
 0x11a   : > { %v809_v17 = vmax.f32 %v772_v13, %v774_v15  ;;  %v704_v18 = vmul.f32 %v3422_v53, %v582_v16  ;;  %v584_v19 = vpop.f32.mrb[9].mxu0 }
 0x11b   : > { %v585_v20 = vpop.f32.mrb[10].mxu0 }
 0x11c   : > { %v2984_v21 = vpack.c.bf16 %v809_v17, %v808_v14  ;;  %v743_v22 = vadd.f32 %v3430_v59, %v704_v18  ;;  %v705_v23 = vmul.f32 %v3422_v53, %v585_v20  ;;  %v587_v24 = vpop.f32.mrb[11].mxu0 }
 0x11e   : > { %v775_v25 = vmax.f32 %v743_v22, 0.0  ;;  %v744_v26 = vadd.f32 %v3430_v59, %v705_v23  ;;  %2985 = vmatpush3.bf16.msra.mxu1 %v2984_v21 }
 0x11f   : > { %2986 = vmatprep.subr.bf16.mxu1 %v3245_v47 }
 0x120   : > { %v1034_v28 = vmax.f32 %v773_v11, %v775_v25  ;;  %v776_v29 = vmax.f32 %v744_v26, 0.0 }
 0x121   : > { %v590_v30 = vpop.f32.mrb[12].mxu0  ;;  %2820 = vmatmul.mubr.msk.f32.vlgmr.msra.gmra.mrb[8].mxu1 %vm810_vm4, %v3450_v27 }
 0x122   : > { %v1035_v31 = vmax.f32 %v774_v15, %v776_v29  ;;  %v706_v32 = vmul.f32 %v3422_v53, %v590_v30  ;;  %v592_v33 = vpop.f32.mrb[13].mxu0  ;;  %2988 = vmatpush3.bf16.msra.mxu1 %v2984_v21  ;;  %2826 = vmatprep.mubr.msk.f32.mxu1 %vm3246_vm3, %v3247_v48 }
 0x123   : > { %v593_v35 = vpop.f32.mrb[14].mxu0  ;;  %2989 = vmatprep.subr.bf16.mxu1 %v3245_v47 }
 0x124   : > { %v745_v36 = vadd.f32 %v3430_v59, %v706_v32  ;;  %v707_v37 = vmul.f32 %v3422_v53, %v593_v35  ;;  %v595_v38 = vpop.f32.mrb[15].mxu0 }
 0x125   : > { %2827 = vmatmul.mubr.msk.f32.vlgmr.msra.gmra.mrb[10].mxu1 %vm810_vm4, %v3461_v34 }
 0x126   : > { %v777_v39 = vmax.f32 %v745_v36, 0.0  ;;  %v746_v40 = vadd.f32 %v3430_v59, %v707_v37  ;;  %2991 = vmatpush3.bf16.msra.mxu1 %v2984_v21  ;;  %2833 = vmatprep.mubr.msk.f32.mxu1 %vm3246_vm3, %v3247_v48 }
 0x127   : > { %2992 = vmatprep.subr.bf16.mxu1 %v3245_v47 }
 0x128   : > { %v1036_v42 = vmax.f32 %v1034_v28, %v777_v39  ;;  %v778_v43 = vmax.f32 %v746_v40, 0.0 }
 0x129   : > { %v598_v44 = vpop.f32.mrb[16].mxu0  ;;  %2834 = vmatmul.mubr.msk.f32.vlgmr.msra.gmra.mrb[12].mxu1 %vm810_vm4, %v3474_v41 }
 0x12a   : > { %v1037_v45 = vmax.f32 %v1035_v31, %v778_v43  ;;  %v708_v46 = vmul.f32 %v3422_v53, %v598_v44  ;;  %v600_v49 = vpop.f32.mrb[17].mxu0  ;;  %2840 = vmatprep.mubr.msk.f32.mxu1 %vm3246_vm3, %v3247_v48 }
 0x12b   : > { %v601_v51 = vpop.f32.mrb[18].mxu0 }
 0x12c   : > { %v2993_v52 = vpack.c.bf16 %v1037_v45, %v1036_v42  ;;  %v747_v54 = vadd.f32 %v3430_v59, %v708_v46  ;;  %v709_v56 = vmul.f32 %v3422_v53, %v601_v51  ;;  %v603_v57 = vpop.f32.mrb[19].mxu0 }
 0x12e   : > { %v779_v58 = vmax.f32 %v747_v54, 0.0  ;;  %v748_v60 = vadd.f32 %v3430_v59, %v709_v56  ;;  %2994 = vmatpush3.bf16.msra.mxu1 %v2993_v52 }
 0x12f   : > { %2995 = vmatprep.subr.bf16.mxu1 %v3245_v47 }
 0x130   : > { %v1252_v61 = vmax.f32 %v777_v39, %v779_v58  ;;  %v780_v63 = vmax.f32 %v748_v60, 0.0 }
 0x131   : > { %v606_v0 = vpop.f32.mrb[20].mxu0  ;;  %2841 = vmatmul.mubr.msk.f32.vlgmr.msra.gmra.mrb[14].mxu1 %vm810_vm4, %v3450_v27 }
 0x132   : > { %v1253_v1 = vmax.f32 %v778_v43, %v780_v63  ;;  %v710_v2 = vmul.f32 %v3422_v53, %v606_v0  ;;  %v608_v3 = vpop.f32.mrb[21].mxu0  ;;  %2997 = vmatpush3.bf16.msra.mxu1 %v2993_v52  ;;  %2847 = vmatprep.mubr.msk.f32.mxu1 %vm3246_vm3, %v3247_v48 }
 0x133   : > { %v609_v5 = vpop.f32.mrb[22].mxu0  ;;  %2998 = vmatprep.subr.bf16.mxu1 %v3245_v47 }
 0x134   : > { %v749_v6 = vadd.f32 %v3430_v59, %v710_v2  ;;  %v711_v7 = vmul.f32 %v3422_v53, %v609_v5  ;;  %v611_v8 = vpop.f32.mrb[23].mxu0 }
 0x135   : > { %2848 = vmatmul.mubr.msk.f32.vlgmr.msra.gmra.mrb[16].mxu1 %vm810_vm4, %v3461_v34 }
 0x136   : > { %v781_v9 = vmax.f32 %v749_v6, 0.0  ;;  %v750_v10 = vadd.f32 %v3430_v59, %v711_v7  ;;  %3000 = vmatpush3.bf16.msra.mxu1 %v2993_v52  ;;  %2854 = vmatprep.mubr.msk.f32.mxu1 %vm3246_vm3, %v3247_v48 }
 0x137   : > { %3001 = vmatprep.subr.bf16.mxu1 %v3245_v47 }
 0x138   : > { %v1254_v11 = vmax.f32 %v1252_v61, %v781_v9  ;;  %v782_v12 = vmax.f32 %v750_v10, 0.0 }
 0x139   : > { %v614_v13 = vpop.f32.mrb[24].mxu0  ;;  %2855 = vmatmul.mubr.msk.f32.vlgmr.msra.gmra.mrb[18].mxu1 %vm810_vm4, %v3474_v41 }
 0x13a   : > { %v1255_v14 = vmax.f32 %v1253_v1, %v782_v12  ;;  %v712_v15 = vmul.f32 %v3422_v53, %v614_v13  ;;  %v616_v16 = vpop.f32.mrb[25].mxu0  ;;  %2861 = vmatprep.mubr.msk.f32.mxu1 %vm3246_vm3, %v3247_v48 }
 0x13b   : > { %v617_v17 = vpop.f32.mrb[26].mxu0 }
 0x13c   : > { %v3002_v18 = vpack.c.bf16 %v1255_v14, %v1254_v11  ;;  %v751_v19 = vadd.f32 %v3430_v59, %v712_v15  ;;  %v713_v20 = vmul.f32 %v3422_v53, %v617_v17  ;;  %v619_v21 = vpop.f32.mrb[27].mxu0 }
 0x13e   : > { %v783_v22 = vmax.f32 %v751_v19, 0.0  ;;  %v752_v23 = vadd.f32 %v3430_v59, %v713_v20  ;;  %3003 = vmatpush3.bf16.msra.mxu1 %v3002_v18 }
 0x13f   : > { %3004 = vmatprep.subr.bf16.mxu1 %v3245_v47 }
 0x140   : > { %v1470_v24 = vmax.f32 %v781_v9, %v783_v22  ;;  %v784_v25 = vmax.f32 %v752_v23, 0.0 }
 0x141   : > { %v622_v26 = vpop.f32.mrb[28].mxu0  ;;  %2862 = vmatmul.mubr.msk.f32.vlgmr.msra.gmra.mrb[20].mxu1 %vm810_vm4, %v3450_v27 }
 0x142   : > { %v1471_v28 = vmax.f32 %v782_v12, %v784_v25  ;;  %v714_v29 = vmul.f32 %v3422_v53, %v622_v26  ;;  %v624_v30 = vpop.f32.mrb[29].mxu0  ;;  %3006 = vmatpush3.bf16.msra.mxu1 %v3002_v18  ;;  %2868 = vmatprep.mubr.msk.f32.mxu1 %vm3246_vm3, %v3247_v48 }
 0x143   : > { %v625_v31 = vpop.f32.mrb[30].mxu0  ;;  %3007 = vmatprep.subr.bf16.mxu1 %v3245_v47 }
 0x144   : > { %v753_v32 = vadd.f32 %v3430_v59, %v714_v29  ;;  %v715_v33 = vmul.f32 %v3422_v53, %v625_v31  ;;  %v627_v35 = vpop.f32.mrb[31].mxu0 }
 0x145   : > { %2869 = vmatmul.mubr.msk.f32.vlgmr.msra.gmra.mrb[22].mxu1 %vm810_vm4, %v3461_v34 }
 0x146   : > { %v785_v36 = vmax.f32 %v753_v32, 0.0  ;;  %v754_v37 = vadd.f32 %v3430_v59, %v715_v33  ;;  %3009 = vmatpush3.bf16.msra.mxu1 %v3002_v18  ;;  %2875 = vmatprep.mubr.msk.f32.mxu1 %vm3246_vm3, %v3247_v48 }
 0x147   : > { %3010 = vmatprep.subr.bf16.mxu1 %v3245_v47 }
 0x148   : > { %v1472_v38 = vmax.f32 %v1470_v24, %v785_v36  ;;  %v786_v39 = vmax.f32 %v754_v37, 0.0 }
 0x149   : > { %v630_v40 = vpop.f32.mrb[32].mxu0  ;;  %2876 = vmatmul.mubr.msk.f32.vlgmr.msra.gmra.mrb[24].mxu1 %vm810_vm4, %v3474_v41 }
 0x14a   : > { %v1473_v42 = vmax.f32 %v1471_v28, %v786_v39  ;;  %v716_v43 = vmul.f32 %v3422_v53, %v630_v40  ;;  %v632_v44 = vpop.f32.mrb[33].mxu0  ;;  %2882 = vmatprep.mubr.msk.f32.mxu1 %vm3246_vm3, %v3247_v48 }
 0x14b   : > { %v633_v45 = vpop.f32.mrb[34].mxu0 }
 0x14c   : > { %v3011_v46 = vpack.c.bf16 %v1473_v42, %v1472_v38  ;;  %v755_v49 = vadd.f32 %v3430_v59, %v716_v43  ;;  %v717_v51 = vmul.f32 %v3422_v53, %v633_v45  ;;  %v635_v52 = vpop.f32.mrb[35].mxu0 }
 0x14e   : > { %v787_v54 = vmax.f32 %v755_v49, 0.0  ;;  %v756_v56 = vadd.f32 %v3430_v59, %v717_v51  ;;  %3012 = vmatpush3.bf16.msra.mxu1 %v3011_v46  ;;  %v728_v49 = vmul.f32 %v3422_v53, %v3417_v50  ;;  %v729_v51 = vmul.f32 %v3422_v53, %v3424_v55 }
 0x14f   : > { %3013 = vmatprep.subr.bf16.mxu1 %v3245_v47 }
 0x150   : > { %v1688_v57 = vmax.f32 %v785_v36, %v787_v54  ;;  %v788_v58 = vmax.f32 %v756_v56, 0.0  ;;  %v730_v56 = vmul.f32 %v3422_v53, %v3433_v62 }
 0x151   : > { %v638_v60 = vpop.f32.mrb[36].mxu0  ;;  %2883 = vmatmul.mubr.msk.f32.vlgmr.msra.gmra.mrb[26].mxu1 %vm810_vm4, %v3450_v27 }
 0x152   : > { %v1689_v61 = vmax.f32 %v786_v39, %v788_v58  ;;  %v718_v63 = vmul.f32 %v3422_v53, %v638_v60  ;;  %v640_v0 = vpop.f32.mrb[37].mxu0  ;;  %3015 = vmatpush3.bf16.msra.mxu1 %v3011_v46  ;;  %2889 = vmatprep.mubr.msk.f32.mxu1 %vm3246_vm3, %v3247_v48  ;;  %v767_v60 = vadd.f32 %v3430_v59, %v728_v49 }
 0x153   : > { %v641_v1 = vpop.f32.mrb[38].mxu0  ;;  %3016 = vmatprep.subr.bf16.mxu1 %v3245_v47  ;;  %v769_v62 = vadd.f32 %v3430_v59, %v730_v56 }
 0x154   : > { %v757_v2 = vadd.f32 %v3430_v59, %v718_v63  ;;  %v719_v3 = vmul.f32 %v3422_v53, %v641_v1  ;;  %v643_v5 = vpop.f32.mrb[39].mxu0  ;;  %v768_v63 = vadd.f32 %v3430_v59, %v729_v51 }
 0x155   : > { %2890 = vmatmul.mubr.msk.f32.vlgmr.msra.gmra.mrb[28].mxu1 %vm810_vm4, %v3461_v34 }
 0x156   : > { %v789_v6 = vmax.f32 %v757_v2, 0.0  ;;  %v758_v7 = vadd.f32 %v3430_v59, %v719_v3  ;;  %3018 = vmatpush3.bf16.msra.mxu1 %v3011_v46  ;;  %2896 = vmatprep.mubr.msk.f32.mxu1 %vm3246_vm3, %v3247_v48 }
 0x157   : > { %3019 = vmatprep.subr.bf16.mxu1 %v3245_v47 }
 0x158   : > { %v1690_v8 = vmax.f32 %v1688_v57, %v789_v6  ;;  %v790_v9 = vmax.f32 %v758_v7, 0.0 }
 0x159   : > { %v646_v10 = vpop.f32.mrb[40].mxu0  ;;  %2897 = vmatmul.mubr.msk.f32.vlgmr.msra.gmra.mrb[30].mxu1 %vm810_vm4, %v3474_v41 }
 0x15a   : > { %v1691_v11 = vmax.f32 %v1689_v61, %v790_v9  ;;  %v720_v12 = vmul.f32 %v3422_v53, %v646_v10  ;;  %v648_v13 = vpop.f32.mrb[41].mxu0  ;;  %2903 = vmatprep.mubr.msk.f32.mxu1 %vm3246_vm3, %v3247_v48  ;;  %v731_v61 = vmul.f32 %v3422_v53, %v3437_v4  ;;  %v799_v4 = vmax.f32 %v767_v60, 0.0 }
 0x15b   : > { %v649_v14 = vpop.f32.mrb[42].mxu0 }
 0x15c   : > { %v3020_v15 = vpack.c.bf16 %v1691_v11, %v1690_v8  ;;  %v759_v16 = vadd.f32 %v3430_v59, %v720_v12  ;;  %v721_v17 = vmul.f32 %v3422_v53, %v649_v14  ;;  %v651_v18 = vpop.f32.mrb[43].mxu0  ;;  %v770_v7 = vadd.f32 %v3430_v59, %v731_v61 }
 0x15d   : > { %v801_v11 = vmax.f32 %v769_v62, 0.0 }
 0x15e   : > { %v791_v19 = vmax.f32 %v759_v16, 0.0  ;;  %v760_v20 = vadd.f32 %v3430_v59, %v721_v17  ;;  %3021 = vmatpush3.bf16.msra.mxu1 %v3020_v15  ;;  %v802_v14 = vmax.f32 %v770_v7, 0.0 }
 0x15f   : > { %3022 = vmatprep.subr.bf16.mxu1 %v3245_v47 }
 0x160   : > { %v1906_v21 = vmax.f32 %v789_v6, %v791_v19  ;;  %v792_v22 = vmax.f32 %v760_v20, 0.0 }
 0x161   : > { %v654_v23 = vpop.f32.mrb[44].mxu0  ;;  %2904 = vmatmul.mubr.msk.f32.vlgmr.msra.gmra.mrb[32].mxu1 %vm810_vm4, %v3450_v27 }
 0x162   : > { %v1907_v24 = vmax.f32 %v790_v9, %v792_v22  ;;  %v722_v25 = vmul.f32 %v3422_v53, %v654_v23  ;;  %v656_v26 = vpop.f32.mrb[45].mxu0  ;;  %3024 = vmatpush3.bf16.msra.mxu1 %v3020_v15  ;;  %2910 = vmatprep.mubr.msk.f32.mxu1 %vm3246_vm3, %v3247_v48  ;;  %v800_v9 = vmax.f32 %v768_v63, 0.0 }
 0x163   : > { %v657_v28 = vpop.f32.mrb[46].mxu0  ;;  %3025 = vmatprep.subr.bf16.mxu1 %v3245_v47 }
 0x164   : > { %v761_v29 = vadd.f32 %v3430_v59, %v722_v25  ;;  %v723_v30 = vmul.f32 %v3422_v53, %v657_v28  ;;  %v659_v31 = vpop.f32.mrb[47].mxu0 }
 0x165   : > { %2911 = vmatmul.mubr.msk.f32.vlgmr.msra.gmra.mrb[34].mxu1 %vm810_vm4, %v3461_v34 }
 0x166   : > { %v793_v32 = vmax.f32 %v761_v29, 0.0  ;;  %v762_v33 = vadd.f32 %v3430_v59, %v723_v30  ;;  %3027 = vmatpush3.bf16.msra.mxu1 %v3020_v15  ;;  %2917 = vmatprep.mubr.msk.f32.mxu1 %vm3246_vm3, %v3247_v48 }
 0x167   : > { %3028 = vmatprep.subr.bf16.mxu1 %v3245_v47 }
 0x168   : > { %v1908_v35 = vmax.f32 %v1906_v21, %v793_v32  ;;  %v794_v36 = vmax.f32 %v762_v33, 0.0 }
 0x169   : > { %v662_v37 = vpop.f32.mrb[48].mxu0  ;;  %2918 = vmatmul.mubr.msk.f32.vlgmr.msra.gmra.mrb[36].mxu1 %vm810_vm4, %v3474_v41 }
 0x16a   : > { %v1909_v38 = vmax.f32 %v1907_v24, %v794_v36  ;;  %v724_v39 = vmul.f32 %v3422_v53, %v662_v37  ;;  %v664_v40 = vpop.f32.mrb[49].mxu0  ;;  %2924 = vmatprep.mubr.msk.f32.mxu1 %vm3246_vm3, %v3247_v48 }
 0x16b   : > { %v665_v42 = vpop.f32.mrb[50].mxu0 }
 0x16c   : > { %v3029_v43 = vpack.c.bf16 %v1909_v38, %v1908_v35  ;;  %v763_v44 = vadd.f32 %v3430_v59, %v724_v39  ;;  %v725_v45 = vmul.f32 %v3422_v53, %v665_v42  ;;  %v667_v46 = vpop.f32.mrb[51].mxu0 }
 0x16e   : > { %v795_v52 = vmax.f32 %v763_v44, 0.0  ;;  %v764_v54 = vadd.f32 %v3430_v59, %v725_v45  ;;  %3030 = vmatpush3.bf16.msra.mxu1 %v3029_v43 }
 0x16f   : > { %3031 = vmatprep.subr.bf16.mxu1 %v3245_v47 }
 0x170   : > { %v2124_v57 = vmax.f32 %v793_v32, %v795_v52  ;;  %v796_v58 = vmax.f32 %v764_v54, 0.0 }
 0x171   : > { %v670_v50 = vpop.f32.mrb[52].mxu0  ;;  %2925 = vmatmul.mubr.msk.f32.vlgmr.msra.gmra.mrb[38].mxu1 %vm810_vm4, %v3450_v27 }
 0x172   : > { %v2125_v55 = vmax.f32 %v794_v36, %v796_v58  ;;  %v726_v0 = vmul.f32 %v3422_v53, %v670_v50  ;;  %v672_v1 = vpop.f32.mrb[53].mxu0  ;;  %3033 = vmatpush3.bf16.msra.mxu1 %v3029_v43  ;;  %2931 = vmatprep.mubr.msk.f32.mxu1 %vm3246_vm3, %v3247_v48 }
 0x173   : > { %v673_v2 = vpop.f32.mrb[54].mxu0  ;;  %3034 = vmatprep.subr.bf16.mxu1 %v3245_v47 }
 0x174   : > { %v765_v3 = vadd.f32 %v3430_v59, %v726_v0  ;;  %v727_v5 = vmul.f32 %v3422_v53, %v673_v2  ;;  %v675_v6 = vpop.f32.mrb[55].mxu0 }
 0x175   : > { %2932 = vmatmul.mubr.msk.f32.vlgmr.msra.gmra.mrb[40].mxu1 %vm810_vm4, %v3461_v34 }
 0x176   : > { %v797_v8 = vmax.f32 %v765_v3, 0.0  ;;  %v766_v10 = vadd.f32 %v3430_v59, %v727_v5  ;;  %3036 = vmatpush3.bf16.msra.mxu1 %v3029_v43  ;;  %2938 = vmatprep.mubr.msk.f32.mxu1 %vm3246_vm3, %v3247_v48 }
 0x177   : > { %3037 = vmatprep.subr.bf16.mxu1 %v3245_v47 }
 0x178   : > { %v2126_v12 = vmax.f32 %v2124_v57, %v797_v8  ;;  %v2342_v13 = vmax.f32 %v797_v8, %v799_v4  ;;  %v798_v53 = vmax.f32 %v766_v10, 0.0 }
 0x179   : > { %2939 = vmatmul.mubr.msk.f32.vlgmr.msra.gmra.mrb[42].mxu1 %vm810_vm4, %v3474_v41 }
 0x17a   : > { %v2127_v15 = vmax.f32 %v2125_v55, %v798_v53  ;;  %v2343_v16 = vmax.f32 %v798_v53, %v800_v9  ;;  %v2344_v17 = vmax.f32 %v2342_v13, %v801_v11  ;;  %2945 = vmatprep.mubr.msk.f32.mxu1 %vm3246_vm3, %v3247_v48 }
 0x17c   : > { %v3038_v59 = vpack.c.bf16 %v2127_v15, %v2126_v12  ;;  %v2345_v18 = vmax.f32 %v2343_v16, %v802_v14 }
 0x17e   : > { %v3047_v19 = vpack.c.bf16 %v2345_v18, %v2344_v17  ;;  %3039 = vmatpush3.bf16.msra.mxu1 %v3038_v59 }
 0x17f   : > { %3040 = vmatprep.subr.bf16.mxu1 %v3245_v47 }
 0x181   : > { %2946 = vmatmul.mubr.msk.f32.vlgmr.msra.gmra.mrb[44].mxu1 %vm810_vm4, %v3450_v27 }
 0x182   : > { %3042 = vmatpush3.bf16.msra.mxu1 %v3038_v59  ;;  %2952 = vmatprep.mubr.msk.f32.mxu1 %vm3246_vm3, %v3247_v48 }
 0x183   : > { %3043 = vmatprep.subr.bf16.mxu1 %v3245_v47 }
 0x185   : > { %2953 = vmatmul.mubr.msk.f32.vlgmr.msra.gmra.mrb[46].mxu1 %vm810_vm4, %v3461_v34 }
 0x186   : > { %3045 = vmatpush3.bf16.msra.mxu1 %v3038_v59  ;;  %2959 = vmatprep.mubr.msk.f32.mxu1 %vm3246_vm3, %v3247_v48 }
 0x187   : > { %3046 = vmatprep.subr.bf16.mxu1 %v3245_v47 }
 0x189   : > { %2960 = vmatmul.mubr.msk.f32.vlgmr.msra.gmra.mrb[48].mxu1 %vm810_vm4, %v3474_v41 }
 0x18a   : > { %3048 = vmatpush3.bf16.msra.mxu1 %v3047_v19  ;;  %2966 = vmatprep.mubr.msk.f32.mxu1 %vm3246_vm3, %v3247_v48 }
 0x18b   : > { %3049 = vmatprep.subr.bf16.mxu1 %v3245_v47 }
 0x18d   : > { %2967 = vmatmul.mubr.msk.f32.vlgmr.msra.gmra.mrb[50].mxu1 %vm810_vm4, %v3450_v27 }
 0x18e   : > { %3051 = vmatpush3.bf16.msra.mxu1 %v3047_v19  ;;  %2973 = vmatprep.mubr.msk.f32.mxu1 %vm3246_vm3, %v3247_v48 }
 0x18f   : > { %3052 = vmatprep.subr.bf16.mxu1 %v3245_v47 }
 0x191   : > { %2974 = vmatmul.mubr.msk.f32.vlgmr.msra.gmra.mrb[52].mxu1 %vm810_vm4, %v3461_v34 }
 0x192   : > { %3054 = vmatpush3.bf16.msra.mxu1 %v3047_v19  ;;  %2980 = vmatprep.mubr.msk.f32.mxu1 %vm3246_vm3, %v3247_v48 }
 0x195   : > { %2981 = vmatmul.mubr.msk.f32.vlgmr.msra.gmra.mrb[54].mxu1 %vm810_vm4, %v3474_v41 }
 0x1f4   : > { %v880_v20 = vpop.f32.mrb[8].mxu1 }
 0x1f5   : > { %v2821_v21 = vpop.f32.mrb[9].mxu1 }
 0x1f8   : > { %v953_v27 = vpop.f32.mrb[10].mxu1 }
 0x1f9   : > { %v1030_v22 = vmax.f32 %v880_v20, %v953_v27  ;;  %v2828_v23 = vpop.f32.mrb[11].mxu1 }
 0x1fc   : > { %v1026_v24 = vpop.f32.mrb[12].mxu1 }
 0x1fd   : > { %v1031_v47 = vmax.f32 %v1030_v22, %v1026_v24  ;;  %v2835_v25 = vpop.f32.mrb[13].mxu1 }
 0x1ff   : > { %1033 = vst.msk [vmem:[%s3638_s10] sm:$0xff] %vm1032_vm5, %v1031_v47 }
 0x204   : > { %v1104_v48 = vpop.f32.mrb[14].mxu1 }
 0x205   : > { %v2842_v34 = vpop.f32.mrb[15].mxu1 }
 0x208   : > { %v1174_v41 = vpop.f32.mrb[16].mxu1 }
 0x209   : > { %v1248_v26 = vmax.f32 %v1104_v48, %v1174_v41  ;;  %v2849_v28 = vpop.f32.mrb[17].mxu1 }
 0x20c   : > { %v1244_v29 = vpop.f32.mrb[18].mxu1 }
 0x20d   : > { %v1249_v30 = vmax.f32 %v1248_v26, %v1244_v29  ;;  %v2856_v31 = vpop.f32.mrb[19].mxu1 }
 0x20f   : > { %2711 = vst.msk [vmem:[%s3638_s10 + $0x8] sm:$0xff] %vm1032_vm5, %v1249_v30 }
 0x214   : > { %v1322_v32 = vpop.f32.mrb[20].mxu1 }
 0x215   : > { %v2863_v33 = vpop.f32.mrb[21].mxu1 }
 0x218   : > { %v1392_v35 = vpop.f32.mrb[22].mxu1 }
 0x219   : > { %v1466_v36 = vmax.f32 %v1322_v32, %v1392_v35  ;;  %v2870_v37 = vpop.f32.mrb[23].mxu1 }
 0x21c   : > { %v1462_v38 = vpop.f32.mrb[24].mxu1 }
 0x21d   : > { %v1467_v39 = vmax.f32 %v1466_v36, %v1462_v38  ;;  %v2877_v40 = vpop.f32.mrb[25].mxu1 }
 0x21f   : > { %2715 = vst.msk [vmem:[%s3638_s10 + $0x10] sm:$0xff] %vm1032_vm5, %v1467_v39 }
 0x224   : > { %v1540_v42 = vpop.f32.mrb[26].mxu1 }
 0x225   : > { %v2884_v43 = vpop.f32.mrb[27].mxu1 }
 0x228   : > { %v1610_v44 = vpop.f32.mrb[28].mxu1 }
 0x229   : > { %v1684_v45 = vmax.f32 %v1540_v42, %v1610_v44  ;;  %v2891_v46 = vpop.f32.mrb[29].mxu1 }
 0x22c   : > { %v1680_v49 = vpop.f32.mrb[30].mxu1 }
 0x22d   : > { %v1685_v51 = vmax.f32 %v1684_v45, %v1680_v49  ;;  %v2898_v52 = vpop.f32.mrb[31].mxu1 }
 0x22f   : > { %2719 = vst.msk [vmem:[%s3638_s10 + $0x18] sm:$0xff] %vm1032_vm5, %v1685_v51 }
 0x234   : > { %v1758_v54 = vpop.f32.mrb[32].mxu1 }
 0x235   : > { %v2905_v56 = vpop.f32.mrb[33].mxu1 }
 0x238   : > { %v1828_v57 = vpop.f32.mrb[34].mxu1 }
 0x239   : > { %v1902_v58 = vmax.f32 %v1758_v54, %v1828_v57  ;;  %v2912_v60 = vpop.f32.mrb[35].mxu1 }
 0x23c   : > { %v1898_v61 = vpop.f32.mrb[36].mxu1 }
 0x23d   : > { %v1903_v50 = vmax.f32 %v1902_v58, %v1898_v61  ;;  %v2919_v63 = vpop.f32.mrb[37].mxu1 }
 0x23f   : > { %2723 = vst.msk [vmem:[%s3638_s10 + $0x20] sm:$0xff] %vm1032_vm5, %v1903_v50 }
 0x244   : > { %v1976_v55 = vpop.f32.mrb[38].mxu1 }
 0x245   : > { %v2926_v0 = vpop.f32.mrb[39].mxu1 }
 0x248   : > { %v2046_v1 = vpop.f32.mrb[40].mxu1 }
 0x249   : > { %v2120_v62 = vmax.f32 %v1976_v55, %v2046_v1  ;;  %v2933_v2 = vpop.f32.mrb[41].mxu1 }
 0x24c   : > { %v2116_v4 = vpop.f32.mrb[42].mxu1 }
 0x24d   : > { %v2121_v3 = vmax.f32 %v2120_v62, %v2116_v4  ;;  %v2940_v5 = vpop.f32.mrb[43].mxu1 }
 0x24f   : > { %2727 = vst.msk [vmem:[%s3638_s10 + $0x28] sm:$0xff] %vm1032_vm5, %v2121_v3 }
 0x254   : > { %v2194_v6 = vpop.f32.mrb[44].mxu1 }
 0x255   : > { %v2947_v7 = vpop.f32.mrb[45].mxu1 }
 0x258   : > { %v2264_v8 = vpop.f32.mrb[46].mxu1 }
 0x259   : > { %v2338_v9 = vmax.f32 %v2194_v6, %v2264_v8  ;;  %v2954_v10 = vpop.f32.mrb[47].mxu1 }
 0x25c   : > { %v2334_v11 = vpop.f32.mrb[48].mxu1 }
 0x25d   : > { %v2339_v12 = vmax.f32 %v2338_v9, %v2334_v11  ;;  %v2961_v13 = vpop.f32.mrb[49].mxu1 }
 0x25f   : > { %2731 = vst.msk [vmem:[%s3638_s10 + $0x30] sm:$0xff] %vm1032_vm5, %v2339_v12 }
 0x260   : > { %v2412_v53 = vpop.f32.mrb[50].mxu1 }
 0x261   : > { %v2968_v14 = vpop.f32.mrb[51].mxu1 }
 0x264   : > { %v2482_v15 = vpop.f32.mrb[52].mxu1 }
 0x265   : > { %v2556_v16 = vmax.f32 %v2412_v53, %v2482_v15  ;;  %v2975_v17 = vpop.f32.mrb[53].mxu1 }
 0x268   : > { %v2552_v59 = vpop.f32.mrb[54].mxu1 }
 0x269   : > { %v2557_v18 = vmax.f32 %v2556_v16, %v2552_v59  ;;  %v2982_v19 = vpop.f32.mrb[55].mxu1 }
 0x26b   : > { %2735 = vst.msk [vmem:[%s3638_s10 + $0x38] sm:$0xff] %vm1032_vm5, %v2557_v18 }
 0x26c   : > { %3192 = shalt.err (!%p3189_p3)
}
 0x26d   : > { %s3193_s26 = scalar_lea.hbm %s3659_s15, 1024  ;;  %s3197_s7 = scalar_lea.hbm %s3713_s5, 2048 }
 0x26e   : > { %p3194_p4 = scmp.ne.s32.totalorder %s3659_s15, %s3193_s26  ;;  %p3198_p9 = scmp.lt.u32.totalorder %s3659_s15, %s3713_s5 }
 0x26f   : > { %p3199_p10 = scmp.lt.u32.totalorder %s3197_s7, %s3193_s26  ;;  %p3201_p12 = scmp.lt.u32.totalorder %s3193_s26, %s3659_s15 }
 0x270   : > { %p3195_p7 = pnand %p3194_p4, %p3319_p5 }
 0x271   : > { %p3200_p11 = por %p3199_p10, %p3198_p9 }
 0x272   : > { %p3196_p8 = pneg %p3195_p7 }
 0x273   : > { %p3202_p13 = por %p3201_p12, %p3200_p11 }
 0x275   : > { %p3203_p0 = pnand %p3202_p13, %p3196_p8 }
 0x277   : > { %3206 = shalt.err (!%p3203_p0)
}
 0x278   : > { %s3249_s10 = smov 128   ;;  %s3250_s11 = smov 8  }
 0x279   : > { %3075 = dma.vmem_to_hbm [thread:$0]  (%p3319_p5), %s3661_s12, 1024, %s3659_s15, %s3667_s16, %s3249_s10, %s3249_s10, %s3250_s11  }
 0x27a PF: > { %p3081_p1 = scmp.ge.s32.totalorder %s3241_s21, 2  ;;  %s2589_s13 = sand.u32 1, %s3229_s18  }
 0x27b   : > { %s2590_s14 = scalar_lea.sflag [#allocation3], %s2589_s13 }
 0x27c   : > { %p3078_p2 = pnand %p3081_p1, %p3323_p6 }
 0x27e   : > { %3224 = dma.done.wait (!%p3078_p2), %s2590_s14, 1024  }
 0x27f   : > { %3226 = vsyncadd (!%p3078_p2), %s2590_s14, 4294966272  ;;  %p15_p3 = scmp.ge.s32.totalorder %s3306_s24, 4   ;;  %s3716_s18 = smov %s3233_s19 }
 0x280   : > { %s3717_s19 = smov %s3237_s20  ;;  %s3718_s20 = smov %s3317_s27 }
 0x281   : > { %s3719_s21 = smov %s3306_s24  ;;  %17 = sbr.rel (!%p15_p3) target bundleno = 3 (0x3), region = 84 }
 0x288   :  { %2595 = vsyncpa [#allocation3], 1 }
 0x289   :  { %2597 = vsyncpa [#allocation3 + $0x1], 1 }

</bundles_post_ra>
